<compile_context>
chip_gen: v7x
topology: tpu7x:2x2x1
jax: 0.10.0
libtpu: 0.0.40
codegen_flags: <defaults>
</compile_context>

<pallas_src>
import functools

import numpy as np
import jax
import jax.numpy as jnp
from jax.experimental import pallas as pl
from jax.experimental.pallas import tpu as pltpu


# ----------------------------- Pallas kernels ------------------------------ #

def _agg_mxu_kernel(w_ref, e_ref, o_ref):
    """out = exp(E_flat @ W) for one row-tile.

    w_ref: (C, G)   VMEM f32, resident block-diagonal log-sigmoid matrix
    e_ref: (TR, C)  VMEM, lane-dense contiguous slab of E (any float dtype)
    o_ref: (TR, G)  VMEM f32 output tile
    """
    e = e_ref[...].astype(jnp.float32)                      # f32 math everywhere
    s = jax.lax.dot_general(
        e, w_ref[...],
        dimension_numbers=(((1,), (0,)), ((), ())),
        preferred_element_type=jnp.float32,
        precision=jax.lax.Precision.HIGHEST,                # exact-f32 MXU passes
    )                                                       # (TR, G)
    o_ref[...] = jnp.exp(s).astype(o_ref.dtype)             # one EUP exp / element


def _agg_row_kernel(logsig_ref, e_ref, o_ref):
    """Fallback (odd K / unaligned B): out = exp(sum_k E[:, k] * logsig[k])."""
    e = e_ref[...].astype(jnp.float32)                          # (TB, K)
    s = jnp.sum(e * logsig_ref[...], axis=-1, keepdims=True)    # (TB, 1)
    o_ref[...] = jnp.exp(s).astype(o_ref.dtype)


# --------------------------------- wrapper ---------------------------------- #

def _collapse_logits(mats):
    # Right-associate the deep-linear collapse: (hidden x hidden) @ (hidden x 1)
    # first -> ~64x fewer glue FLOPs than left-to-right. Tiny; stays in XLA.
    col = mats[-1]
    for m in mats[-2::-1]:
        col = m @ col                                           # (K, 1)
    return col[:, 0]                                            # (K,) == .squeeze(1)


def _pick_rows(R, C, *, vmem_budget_bytes=24 << 20):
    """Rows per tile: double-buffered E rows (C*4 B) + double-buffered lane-padded
    output rows (128*4 B), kept under ~24 MiB so everything fits v7x's 32 MiB
    default scoped VMEM with headroom (v5e/v6e have even more)."""
    per_row = 2 * (C * 4) + 2 * (128 * 4)
    cap = max(8, (vmem_budget_bytes // per_row) // 8 * 8)
    return R if R <= cap else cap


def discounted_distance_aggregate(mats, expected_quasipartitions, *, rows_per_tile=None):
    """JAX/Pallas equivalent of DiscountedDistanceAggregator.forward."""
    logits = _collapse_logits(mats)
    # log_sigmoid(x) = -softplus(-x): avoids log(sigmoid) -> -inf (and 0*inf NaN).
    logsig = jax.nn.log_sigmoid(logits).astype(jnp.float32)        # (K,)

    e = expected_quasipartitions
    B, K = e.shape
    out_dtype = jnp.float32      # matches torch promotion of f32 logits ** E

    # Zero-copy fast path: reinterpret the row-major (B, K) slab as (R, C).
    C = next((c for c in (256, 128) if c % K == 0 and (B * K) % c == 0), None)
    if C is None:
        # TODO(synk): odd K / unaligned B use the (B, K)-native row-tile path
        # (still transpose/pad-free, just lane-sparse in VMEM).
        return _aggregate_rows_fallback(logsig, e, out_dtype)

    G = C // K                     # batch elements per flattened row
    R = (B * K) // C               # number of flattened rows
    eye = jnp.eye(G, dtype=jnp.float32)
    # Block-diagonal W: W[c, j] = logsig[c % K] if (c // K == j) else 0.
    w = (eye[:, None, :] * logsig[None, :, None]).reshape(C, G)    # (C, G)
    e_flat = e.reshape(R, C)       # contiguous row-major reshape: no HBM copy

    tr = rows_per_tile if rows_per_tile is not None else _pick_rows(R, C)
    # TODO(synk): on v7x, experiment with dimension_semantics=(pltpu.CORE_PARALLEL,)
    # plus a forced >=2-tile split (>=1024 rows/tile) to shard the batch over both TCs.
    out2d = pl.pallas_call(
        _agg_mxu_kernel,
        out_shape=jax.ShapeDtypeStruct((R, G), out_dtype),
        grid_spec=pltpu.PrefetchScalarGridSpec(
            num_scalar_prefetch=0,
            grid=(pl.cdiv(R, tr),),
            in_specs=[
                pl.BlockSpec((C, G), lambda i: (0, 0)),     # resident log-sigmoid block-diag
                pl.BlockSpec((tr, C), lambda i: (i, 0)),    # contiguous, lane-dense E slab
            ],
            out_specs=pl.BlockSpec((tr, G), lambda i: (i, 0)),
        ),
        compiler_params=pltpu.CompilerParams(
            dimension_semantics=("parallel",),
            vmem_limit_bytes=32 << 20,
        ),
    )(w, e_flat)
    # Row-major unflatten: out2d[r, j] is batch element b = r*G + j.
    return out2d.reshape(B)


def _aggregate_rows_fallback(logsig, e, out_dtype):
    B, K = e.shape
    tb = B if B <= 8192 else 8192           # (tb, K) lane-pads to 128 in VMEM
    out2d = pl.pallas_call(
        _agg_row_kernel,
        out_shape=jax.ShapeDtypeStruct((B, 1), out_dtype),
        grid_spec=pltpu.PrefetchScalarGridSpec(
            num_scalar_prefetch=0,
            grid=(pl.cdiv(B, tb),),
            in_specs=[
                pl.BlockSpec((1, K), lambda i: (0, 0)),     # resident log-sigmoid row
                pl.BlockSpec((tb, K), lambda i: (i, 0)),    # contiguous E rows
            ],
            out_specs=pl.BlockSpec((tb, 1), lambda i: (i, 0)),
        ),
        compiler_params=pltpu.CompilerParams(
            dimension_semantics=("parallel",),
            vmem_limit_bytes=32 << 20,
        ),
    )(logsig.reshape(1, K), e)
    return out2d[:, 0]


# ------------------------- deterministic parameter init --------------------- #

def init_discounted_distance_aggregator(num_quasipartition_mixtures, hidden_dim=64):
    """Replicates DiscountedDistanceAggregator.__init__ deterministically.

    beta_net = DeepLinearNet(input_dim=1, output_dim=k): mats such that
    collapse() = mats[0] @ mats[1] @ mats[2] has shape (k, 1). mats[0] is then
    adjusted so collapse() lands in [low, high] per coordinate, guaranteeing
    prod(sigmoid(logits)**0.5) in [0.5, 0.75].
    """
    k = num_quasipartition_mixtures
    key = jax.random.PRNGKey(0)
    k1, k2, k3, k4 = jax.random.split(key, 4)

    m0 = jax.random.normal(k1, (k, hidden_dim), jnp.float32) / np.sqrt(hidden_dim)
    m1 = jax.random.normal(k2, (hidden_dim, hidden_dim), jnp.float32) / np.sqrt(hidden_dim)
    m2 = jax.random.normal(k3, (hidden_dim, 1), jnp.float32)

    low_out, high_out = 0.5, 0.75
    low = -np.log(low_out ** (-2.0 / k) - 1.0)
    high = -np.log(high_out ** (-2.0 / k) - 1.0)

    out_before_last = m1 @ m2                                   # (hidden, 1)
    norm = jnp.linalg.norm(out_before_last)
    u = out_before_last / norm                                  # (hidden, 1)
    r = jax.random.uniform(k4, (k, 1), jnp.float32, minval=low, maxval=high)
    # ms[0].sub_(ms[0] @ u @ u.T).add_((r / norm) @ u.T)
    m0 = m0 - (m0 @ u) @ u.T + (r / norm) @ u.T

    mats = (m0, m1, m2)

    # q = collapse().squeeze(1).sigmoid().pow(0.5).prod(); assert low <= q <= high
    logits = (m0 @ m1 @ m2)[:, 0]
    q = float(jnp.prod(jax.nn.sigmoid(logits) ** 0.5))
    assert low_out <= q <= high_out, q
    return mats


# --------------------------------- reference -------------------------------- #

def _reference_forward(mats, expected_quasipartitions):
    logits = functools.reduce(jnp.matmul, mats)[:, 0]
    sig = jax.nn.sigmoid(logits)[None, :]
    return jnp.prod(sig ** expected_quasipartitions, axis=-1)


if __name__ == "__main__":
    K = 8         # num_quasipartition_mixtures
    B = 1024      # batch of expected quasipartitions

    mats = init_discounted_distance_aggregator(K)

    # expected quasipartitions live in [0, 1]
    e = jax.random.uniform(jax.random.PRNGKey(0), (B, K), jnp.float32)

    ref = _reference_forward(mats, e)

    # Default tiling (single tile for this small B).
    out = jax.block_until_ready(discounted_distance_aggregate(mats, e))
    assert out.shape == (B,)
    np.testing.assert_allclose(np.asarray(out), np.asarray(ref), rtol=1e-4, atol=1e-6)

    # Also exercise the multi-tile grid path (4 row tiles).
    out_tiled = jax.block_until_ready(
        discounted_distance_aggregate(mats, e, rows_per_tile=8))
    np.testing.assert_allclose(np.asarray(out_tiled), np.asarray(ref), rtol=1e-4, atol=1e-6)

    print("KERNEL_OK")
</pallas_src>

<mosaic_0001>
module attributes {stable_mosaic.version = 11 : i64} {
  func.func @_agg_mxu_kernel(%arg0: i32, %arg1: memref<256x32xf32, #tpu.memory_space<vmem>>, %arg2: memref<32x256xf32, #tpu.memory_space<vmem>>, %arg3: memref<32x32xf32, #tpu.memory_space<vmem>>) attributes {dimension_semantics = [#tpu.dimension_semantics<parallel>], iteration_bounds = array<i64: 1>, scalar_prefetch = 0 : i64, scratch_operands = 0 : i64, tpu.core_type = #tpu.core_type<tc>, window_params = [{pipeline_mode = #tpu.pipeline_mode<synchronous>, transform_indices = @transform_0, window_bounds = array<i64: 256, 32>}, {transform_indices = @transform_1, window_bounds = array<i64: 32, 256>}, {transform_indices = @transform_2, window_bounds = array<i64: 32, 32>}]} {
    %c0 = arith.constant 0 : index
    %c0_0 = arith.constant 0 : index
    %0 = vector.load %arg2[%c0, %c0_0] : memref<32x256xf32, #tpu.memory_space<vmem>>, vector<32x256xf32>
    %c0_1 = arith.constant 0 : index
    %c0_2 = arith.constant 0 : index
    %1 = vector.load %arg1[%c0_1, %c0_2] : memref<256x32xf32, #tpu.memory_space<vmem>>, vector<256x32xf32>
    %cst = arith.constant dense<0.000000e+00> : vector<32x32xf32>
    %2 = tpu.matmul %0, %1, %cst {dimension_numbers = #tpu.dot_dimension_numbers<[1], [0], [0], [1], [0, 0, 1, 1], [], []>, precision = #tpu.contract_precision<fp32>} : vector<32x256xf32>, vector<256x32xf32>, vector<32x32xf32> -> vector<32x32xf32>
    %3 = math.exp %2 : vector<32x32xf32>
    %c0_3 = arith.constant 0 : index
    %c0_4 = arith.constant 0 : index
    %4 = vector.load %arg3[%c0_3, %c0_4] : memref<32x32xf32, #tpu.memory_space<vmem>>, vector<32x32xf32>
    tpu.vector_store %arg3[%c0_3, %c0_4], %3 {strides = array<i32>} : memref<32x32xf32, #tpu.memory_space<vmem>>, vector<32x32xf32>,
    return
  }
  func.func @transform_0(%arg0: i32) -> (i32, i32) {
    %c0_i32 = arith.constant 0 : i32
    %c0_i32_0 = arith.constant 0 : i32
    %c0_i32_1 = arith.constant 0 : i32
    return %c0_i32, %c0_i32_0 : i32, i32
  }
  func.func @transform_1(%arg0: i32) -> (i32, i32) {
    %c0_i32 = arith.constant 0 : i32
    %c0_i32_0 = arith.constant 0 : i32
    return %arg0, %c0_i32 : i32, i32
  }
  func.func @transform_2(%arg0: i32) -> (i32, i32) {
    %c0_i32 = arith.constant 0 : i32
    %c0_i32_0 = arith.constant 0 : i32
    return %arg0, %c0_i32 : i32, i32
  }
}

</mosaic_0001>

<bundles_post_ra>
// kernel: tpu_custom_call.1
= control target key start
LH: loop header
LB: loop body
LE: loop exit
PB: predicated region body
PF: predicated region fallthrough
CT: control target
= control target key end

     0   :  { %s2252_s0 = inlined_call_operand.vmem [shape: f32[256,32], index: 0, kind: input, shape index: {}]   ;;  %s2253_s1 = inlined_call_operand.vmem [shape: f32[32,256], index: 1, kind: input, shape index: {}]   ;;  %s2254_s2 = inlined_call_operand.hbm [shape: f32[32,32], index: 2, kind: output, shape index: {}]  }
   0x1   :  { %v36_v0 = vld [vmem:[%s2252_s0 + $0x80] sm:$0xff]  ;;  %v37_v1 = vld [vmem:[%s2252_s0 + $0x88] sm:$0xff]  ;;  %v38_v7 = vld [vmem:[%s2252_s0 + $0x90] sm:$0xff] }
   0x2   :  { %v20_v2 = vld [vmem:[%s2252_s0] sm:$0xff]  ;;  %v101_v3 = vand.u32 4294901760, %v36_v0  ;;  %v104_v4 = vand.u32 4294901760, %v37_v1  ;;  %v21_v5 = vld [vmem:[%s2252_s0 + $0x8] sm:$0xff]  ;;  %v39_v8 = vld [vmem:[%s2252_s0 + $0x98] sm:$0xff]  ;;  %v107_v10 = vand.u32 4294901760, %v38_v7 }
   0x3   :  { %v53_v6 = vand.u32 4294901760, %v20_v2  ;;  %v56_v9 = vand.u32 4294901760, %v21_v5  ;;  %v110_v11 = vand.u32 4294901760, %v39_v8  ;;  %v22_v12 = vld [vmem:[%s2252_s0 + $0x10] sm:$0xff]  ;;  %v23_v13 = vld [vmem:[%s2252_s0 + $0x18] sm:$0xff]  ;;  %v40_v18 = vld [vmem:[%s2252_s0 + $0xa0] sm:$0xff] }
   0x4   :  { %v1644_v14 = vpack.c.bf16 %v104_v4, %v101_v3  ;;  %v59_v16 = vand.u32 4294901760, %v22_v12  ;;  %v62_v17 = vand.u32 4294901760, %v23_v13  ;;  %v41_v19 = vld [vmem:[%s2252_s0 + $0xa8] sm:$0xff]  ;;  %v24_v23 = vld [vmem:[%s2252_s0 + $0x20] sm:$0xff]  ;;  %v1667_v25 = vsub.f32 %v38_v7, %v107_v10  ;;  %v42_v37 = vld [vmem:[%s2252_s0 + $0xb0] sm:$0xff] }
   0x5   :  { %v1646_v15 = vsub.f32 %v20_v2, %v53_v6  ;;  %v1654_v20 = vpack.c.bf16 %v56_v9, %v53_v6  ;;  %v1656_v21 = vsub.f32 %v21_v5, %v56_v9  ;;  %v1658_v22 = vpack.c.bf16 %v110_v11, %v107_v10  ;;  %v25_v24 = vld [vmem:[%s2252_s0 + $0x28] sm:$0xff]  ;;  %v43_v42 = vld [vmem:[%s2252_s0 + $0xb8] sm:$0xff]  ;;  %v26_v55 = vld [vmem:[%s2252_s0 + $0x30] sm:$0xff] }
   0x6   :  { %2326 = vst [vmem:[#allocation5_spill] sm:$0xff] %v1644_v14  ;;  %1376 = vmatprep.subr.bf16.mxu0 %v1644_v14  ;;  %v1669_v26 = vsub.f32 %v39_v8, %v110_v11  ;;  %v1671_v27 = vpack.c.bf16 %v62_v17, %v59_v16  ;;  %v1673_v28 = vsub.f32 %v22_v12, %v59_v16  ;;  %v113_v29 = vand.u32 4294901760, %v40_v18  ;;  %v27_v56 = vld [vmem:[%s2252_s0 + $0x38] sm:$0xff] }
   0x7   :  { %1378 = vmatpush3.bf16.msra.mxu0 %v1654_v20  ;;  %v116_v30 = vand.u32 4294901760, %v41_v19  ;;  %v1676_v31 = vsub.f32 %v36_v0, %v101_v3  ;;  %v1678_v32 = vsub.f32 %v37_v1, %v104_v4  ;;  %v65_v33 = vand.u32 4294901760, %v24_v23 }
   0x8   :  { %1380 = vmatprep.subr.bf16.mxu0 %v1658_v22  ;;  %v68_v34 = vand.u32 4294901760, %v25_v24  ;;  %v2271_v35 = vand.u32 4294901760, %v1646_v15  ;;  %v2270_v36 = vand.u32 4294901760, %v1656_v21  ;;  %v1686_v38 = vsub.f32 %v23_v13, %v62_v17 }
   0x9   :  { %v1688_v39 = vpack.c.bf16 %v116_v30, %v113_v29  ;;  %v1690_v40 = vsub.f32 %v40_v18, %v113_v29  ;;  %v2276_v41 = vand.u32 4294901760, %v1676_v31  ;;  %v1696_v43 = vsub.f32 %v41_v19, %v116_v30 }
   0xa   :  { %v2273_v44 = vand.u32 4294901760, %v1678_v32  ;;  %v1699_v45 = vpack.c.bf16 %v68_v34, %v65_v33  ;;  %v1701_v46 = vsub.f32 %v24_v23, %v65_v33  ;;  %v213_v48 = vsub.f32 %v1646_v15, %v2271_v35 }
   0xb   :  { %1382 = vmatpush3.bf16.msra.mxu0 %v1671_v27  ;;  %v325_v47 = vsub.f32 %v1676_v31, %v2276_v41  ;;  %v220_v49 = vsub.f32 %v1656_v21, %v2270_v36  ;;  %v119_v50 = vand.u32 4294901760, %v42_v37  ;;  %v122_v52 = vand.u32 4294901760, %v43_v42 }
   0xc   :  { %1384 = vmatprep.subr.bf16.mxu0 %v1688_v39  ;;  %v332_v51 = vsub.f32 %v1678_v32, %v2273_v44  ;;  %v2268_v53 = vand.u32 4294901760, %v1667_v25  ;;  %v2267_v54 = vand.u32 4294901760, %v1669_v26  ;;  %v1725_v58 = vsub.f32 %v25_v24, %v68_v34 }
   0xd   :  { %v326_v57 = vand.u32 4294901760, %v325_v47  ;;  %v214_v59 = vand.u32 4294901760, %v213_v48  ;;  %v221_v60 = vand.u32 4294901760, %v220_v49  ;;  %v1727_v62 = vpack.c.bf16 %v122_v52, %v119_v50 }
   0xe   :  { %v333_v61 = vand.u32 4294901760, %v332_v51  ;;  %v1729_v63 = vsub.f32 %v42_v37, %v119_v50  ;;  %v339_v0 = vsub.f32 %v1667_v25, %v2268_v53 }
   0xf   :  { %7 = vsyncpa [#allocation3], 0  ;;  %1386 = vmatpush3.bf16.msra.mxu0 %v1699_v45  ;;  %v1409_v1 = vpack.c.bf16 %v221_v60, %v214_v59  ;;  %v346_v2 = vsub.f32 %v1669_v26, %v2267_v54  ;;  %v71_v3 = vand.u32 4294901760, %v26_v55  ;;  %v74_v4 = vand.u32 4294901760, %v27_v56  ;;  %v44_v5 = vld [vmem:[%s2252_s0 + $0xc0] sm:$0xff]  ;;  %v45_v6 = vld [vmem:[%s2252_s0 + $0xc8] sm:$0xff] }
  0x10   :  { %v1407_v7 = vpack.c.bf16 %v333_v61, %v326_v57  ;;  %1388 = vmatprep.subr.bf16.mxu0 %v1727_v62  ;;  %v340_v8 = vand.u32 4294901760, %v339_v0  ;;  %v2266_v9 = vand.u32 4294901760, %v1673_v28  ;;  %v2263_v10 = vand.u32 4294901760, %v1686_v38  ;;  %v28_v11 = vld [vmem:[%s2252_s0 + $0x40] sm:$0xff]  ;;  %v29_v29 = vld [vmem:[%s2252_s0 + $0x48] sm:$0xff]  ;;  %v47_v57 = vld [vmem:[%s2252_s0 + $0xd8] sm:$0xff] }
  0x11   :  { %v1750_v12 = vsub.f32 %v43_v42, %v122_v52  ;;  %v347_v13 = vand.u32 4294901760, %v346_v2  ;;  %v1752_v16 = vpack.c.bf16 %v74_v4, %v71_v3  ;;  %v1754_v17 = vsub.f32 %v26_v55, %v71_v3 }
  0x12   :  { %1408 = vmatprep.subr.bf16.mxu1 %v1407_v7  ;;  %v227_v18 = vsub.f32 %v1673_v28, %v2266_v9  ;;  %v234_v19 = vsub.f32 %v1686_v38, %v2263_v10  ;;  %v125_v23 = vand.u32 4294901760, %v44_v5  ;;  %v128_v24 = vand.u32 4294901760, %v45_v6 }
  0x13   :  { %1410 = vmatpush3.bf16.msra.mxu1 %v1409_v1  ;;  %v1411_v30 = vpack.c.bf16 %v347_v13, %v340_v8  ;;  %1390 = vmatpush3.bf16.msra.mxu0 %v1752_v16  ;;  %v2261_v33 = vand.u32 4294901760, %v1690_v40  ;;  %v2260_v34 = vand.u32 4294901760, %v1696_v43  ;;  %v77_v37 = vand.u32 4294901760, %v28_v11  ;;  %v30_v1 = vld [vmem:[%s2252_s0 + $0x50] sm:$0xff] }
  0x14   :  { %v1768_v42 = vsub.f32 %v27_v56, %v74_v4  ;;  %v228_v47 = vand.u32 4294901760, %v227_v18  ;;  %v235_v48 = vand.u32 4294901760, %v234_v19  ;;  %v1770_v49 = vpack.c.bf16 %v128_v24, %v125_v23  ;;  %v46_v56 = vld [vmem:[%s2252_s0 + $0xd0] sm:$0xff]  ;;  %v31_v18 = vld [vmem:[%s2252_s0 + $0x58] sm:$0xff] }
  0x15   :  { %1412 = vmatprep.subr.bf16.mxu1 %v1411_v30  ;;  %v1772_v50 = vsub.f32 %v44_v5, %v125_v23  ;;  %v353_v51 = vsub.f32 %v1690_v40, %v2261_v33  ;;  %v360_v52 = vsub.f32 %v1696_v43, %v2260_v34  ;;  %v80_v55 = vand.u32 4294901760, %v29_v29 }
  0x16   :  { %2327 = vst [vmem:[#allocation6_spill] sm:$0xff] %v1770_v49  ;;  %v1413_v59 = vpack.c.bf16 %v235_v48, %v228_v47  ;;  %1392 = vmatprep.subr.bf16.mxu0 %v1770_v49  ;;  %v1787_v60 = vsub.f32 %v45_v6, %v128_v24  ;;  %v2258_v61 = vand.u32 4294901760, %v1701_v46  ;;  %v2257_v0 = vand.u32 4294901760, %v1725_v58 }
  0x17   :  { %v354_v2 = vand.u32 4294901760, %v353_v51  ;;  %v361_v3 = vand.u32 4294901760, %v360_v52  ;;  %v1794_v4 = vpack.c.bf16 %v80_v55, %v77_v37  ;;  %v1796_v5 = vsub.f32 %v28_v11, %v77_v37 }
  0x18   :  { %1414 = vmatpush3.bf16.msra.mxu1 %v1413_v59  ;;  %v241_v6 = vsub.f32 %v1701_v46, %v2258_v61  ;;  %v248_v7 = vsub.f32 %v1725_v58, %v2257_v0  ;;  %v131_v8 = vand.u32 4294901760, %v46_v56  ;;  %v134_v13 = vand.u32 4294901760, %v47_v57 }
  0x19   :  { %2328 = vst [vmem:[#allocation7_spill] sm:$0xff] %v1794_v4  ;;  %v1415_v19 = vpack.c.bf16 %v361_v3, %v354_v2  ;;  %1394 = vmatpush3.bf16.msra.mxu0 %v1794_v4  ;;  %v2256_v11 = vand.u32 4294901760, %v1729_v63  ;;  %v2255_v23 = vand.u32 4294901760, %v1750_v12  ;;  %v83_v24 = vand.u32 4294901760, %v30_v1 }
  0x1a   :  { %v1810_v30 = vsub.f32 %v29_v29, %v80_v55  ;;  %v242_v37 = vand.u32 4294901760, %v241_v6  ;;  %v249_v47 = vand.u32 4294901760, %v248_v7  ;;  %v1812_v48 = vpack.c.bf16 %v134_v13, %v131_v8  ;;  %v48_v29 = vld [vmem:[%s2252_s0 + $0xe0] sm:$0xff]  ;;  %v49_v55 = vld [vmem:[%s2252_s0 + $0xe8] sm:$0xff] }
  0x1b   :  { %1416 = vmatprep.subr.bf16.mxu1 %v1415_v19  ;;  %v1814_v51 = vsub.f32 %v46_v56, %v131_v8  ;;  %v367_v52 = vsub.f32 %v1729_v63, %v2256_v11  ;;  %v374_v59 = vsub.f32 %v1750_v12, %v2255_v23  ;;  %v86_v2 = vand.u32 4294901760, %v31_v18  ;;  %v32_v8 = vld [vmem:[%s2252_s0 + $0x60] sm:$0xff] }
  0x1c   :  { %2329 = vst [vmem:[#allocation8_spill] sm:$0xff] %v1812_v48  ;;  %v1417_v3 = vpack.c.bf16 %v249_v47, %v242_v37  ;;  %1396 = vmatprep.subr.bf16.mxu0 %v1812_v48  ;;  %v1829_v56 = vsub.f32 %v47_v57, %v134_v13  ;;  %v2259_v6 = vand.u32 4294901760, %v1754_v17  ;;  %v2262_v7 = vand.u32 4294901760, %v1768_v42 }
  0x1d   :  { %v368_v19 = vand.u32 4294901760, %v367_v52  ;;  %v375_v23 = vand.u32 4294901760, %v374_v59  ;;  %v1836_v11 = vpack.c.bf16 %v86_v2, %v83_v24  ;;  %v1838_v0 = vsub.f32 %v30_v1, %v83_v24  ;;  %v33_v52 = vld [vmem:[%s2252_s0 + $0x68] sm:$0xff] }
  0x1e   :  { %1418 = vmatpush3.bf16.msra.mxu1 %v1417_v3  ;;  %v255_v57 = vsub.f32 %v1754_v17, %v2259_v6  ;;  %v262_v13 = vsub.f32 %v1768_v42, %v2262_v7  ;;  %v137_v37 = vand.u32 4294901760, %v48_v29  ;;  %v140_v47 = vand.u32 4294901760, %v49_v55 }
  0x1f   :  { %2330 = vst [vmem:[#allocation9_spill] sm:$0xff] %v1836_v11  ;;  %v1419_v59 = vpack.c.bf16 %v375_v23, %v368_v19  ;;  %1398 = vmatpush3.bf16.msra.mxu0 %v1836_v11  ;;  %v2265_v1 = vand.u32 4294901760, %v1772_v50  ;;  %v2264_v24 = vand.u32 4294901760, %v1787_v60  ;;  %v89_v3 = vand.u32 4294901760, %v32_v8  ;;  %v19_v11 = vld [vmem:[%s2253_s1 + $0x38] sm:$0xff] }
  0x20   :  { %v1852_v61 = vsub.f32 %v31_v18, %v86_v2  ;;  %v256_v6 = vand.u32 4294901760, %v255_v57  ;;  %v263_v34 = vand.u32 4294901760, %v262_v13  ;;  %v1854_v33 = vpack.c.bf16 %v140_v47, %v137_v37  ;;  %v50_v18 = vld [vmem:[%s2252_s0 + $0xf0] sm:$0xff]  ;;  %v51_v2 = vld [vmem:[%s2252_s0 + $0xf8] sm:$0xff] }
  0x21   :  { %1420 = vmatprep.subr.bf16.mxu1 %v1419_v59  ;;  %v1856_v7 = vsub.f32 %v48_v29, %v137_v37  ;;  %v381_v23 = vsub.f32 %v1772_v50, %v2265_v1  ;;  %v388_v19 = vsub.f32 %v1787_v60, %v2264_v24  ;;  %v92_v10 = vand.u32 4294901760, %v33_v52  ;;  %v34_v59 = vld [vmem:[%s2252_s0 + $0x70] sm:$0xff] }
  0x22   :  { %2331 = vst [vmem:[#allocation10_spill] sm:$0xff] %v1854_v33  ;;  %v1421_v57 = vpack.c.bf16 %v263_v34, %v256_v6  ;;  %1400 = vmatprep.subr.bf16.mxu0 %v1854_v33  ;;  %v1871_v29 = vsub.f32 %v49_v55, %v140_v47  ;;  %v2269_v13 = vand.u32 4294901760, %v1796_v5  ;;  %v2272_v37 = vand.u32 4294901760, %v1810_v30 }
  0x23   :  { %v382_v24 = vand.u32 4294901760, %v381_v23  ;;  %v389_v1 = vand.u32 4294901760, %v388_v19  ;;  %v1878_v9 = vpack.c.bf16 %v92_v10, %v89_v3  ;;  %v1880_v54 = vsub.f32 %v32_v8, %v89_v3  ;;  %v35_v23 = vld [vmem:[%s2252_s0 + $0x78] sm:$0xff] }
  0x24   :  { %1422 = vmatpush3.bf16.msra.mxu1 %v1421_v57  ;;  %v269_v34 = vsub.f32 %v1796_v5, %v2269_v13  ;;  %v276_v55 = vsub.f32 %v1810_v30, %v2272_v37  ;;  %v143_v6 = vand.u32 4294901760, %v50_v18  ;;  %v146_v47 = vand.u32 4294901760, %v51_v2 }
  0x25   :  { %2332 = vst [vmem:[#allocation11_spill] sm:$0xff] %v1878_v9  ;;  %v1423_v19 = vpack.c.bf16 %v389_v1, %v382_v24  ;;  %1402 = vmatpush3.bf16.msra.mxu0 %v1878_v9  ;;  %v2275_v8 = vand.u32 4294901760, %v1814_v51  ;;  %v2274_v3 = vand.u32 4294901760, %v1829_v56  ;;  %v95_v57 = vand.u32 4294901760, %v34_v59 }
  0x26   :  { %v1894_v53 = vsub.f32 %v33_v52, %v92_v10  ;;  %v270_v13 = vand.u32 4294901760, %v269_v34  ;;  %v277_v36 = vand.u32 4294901760, %v276_v55  ;;  %v1896_v35 = vpack.c.bf16 %v146_v47, %v143_v6  ;;  %v13_v10 = vld [vmem:[%s2253_s1 + $0x8] sm:$0xff] }
  0x27   :  { %1424 = vmatprep.subr.bf16.mxu1 %v1423_v19  ;;  %v1898_v37 = vsub.f32 %v50_v18, %v143_v6  ;;  %v395_v1 = vsub.f32 %v1814_v51, %v2275_v8  ;;  %v402_v24 = vsub.f32 %v1829_v56, %v2274_v3  ;;  %v98_v44 = vand.u32 4294901760, %v35_v23  ;;  %v12_v6 = vld [vmem:[%s2253_s1] sm:$0xff] }
  0x28   :  { %2333 = vst [vmem:[#allocation12_spill] sm:$0xff] %v1896_v35  ;;  %v1425_v52 = vpack.c.bf16 %v277_v36, %v270_v13  ;;  %1404 = vmatprep.subr.bf16.mxu0 %v1896_v35  ;;  %v1910_v34 = vsub.f32 %v51_v2, %v146_v47  ;;  %v2279_v18 = vand.u32 4294901760, %v1838_v0  ;;  %v2280_v55 = vand.u32 4294901760, %v1852_v61 }
  0x29   :  { %v396_v19 = vand.u32 4294901760, %v395_v1  ;;  %v403_v3 = vand.u32 4294901760, %v402_v24  ;;  %v1917_v8 = vpack.c.bf16 %v98_v44, %v95_v57  ;;  %v1919_v41 = vsub.f32 %v34_v59, %v95_v57 }
  0x2a   :  { %2334 = vst [vmem:[#allocation13_spill] sm:$0xff] %v1910_v34  ;;  %1426 = vmatpush3.bf16.msra.mxu1 %v1425_v52  ;;  %v283_v36 = vsub.f32 %v1838_v0, %v2279_v18  ;;  %v290_v2 = vsub.f32 %v1852_v61, %v2280_v55  ;;  %v1927_v13 = vand.u32 4294901760, %v13_v10  ;;  %v2283_v47 = vand.u32 4294901760, %v1856_v7 }
  0x2b   :  { %2335 = vst [vmem:[#allocation14_spill] sm:$0xff] %v1917_v8  ;;  %2336 = vst [vmem:[#allocation15_spill] sm:$0xff] %v1919_v41  ;;  %v1427_v35 = vpack.c.bf16 %v403_v3, %v396_v19  ;;  %1406 = vmatpush3.bf16.msra.mxu0 %v1917_v8  ;;  %v2289_v1 = vand.u32 4294901760, %v1871_v29  ;;  %v1439_v59 = vpack.c.bf16 %v1678_v32, %v1676_v31  ;;  %v1934_v57 = vand.u32 4294901760, %v12_v6 }
  0x2c   :  { %2337 = vst [vmem:[#allocation16_spill] sm:$0xff] %v1927_v13  ;;  %v284_v24 = vand.u32 4294901760, %v283_v36  ;;  %v291_v52 = vand.u32 4294901760, %v290_v2  ;;  %v1937_v18 = vsub.f32 %v13_v10, %v1927_v13  ;;  %v409_v55 = vsub.f32 %v1856_v7, %v2283_v47  ;;  %434 = vmatprep.mubr.f32.mxu1 %v1927_v13 }
  0x2d   :  { %2338 = vst [vmem:[#allocation17_spill] sm:$0xff] %v1934_v57  ;;  %1428 = vmatprep.subr.bf16.mxu1 %v1427_v35  ;;  %v416_v3 = vsub.f32 %v1871_v29, %v2289_v1  ;;  %1440 = vmatprep.subr.bf16.mxu0 %v1439_v59  ;;  %v1947_v19 = vsub.f32 %v12_v6, %v1934_v57  ;;  %v2288_v36 = vand.u32 4294901760, %v1880_v54  ;;  %v2290_v10 = vand.u32 4294901760, %v1894_v53 }
  0x2e   :  { %v1951_v2 = vsub.f32 %v35_v23, %v98_v44  ;;  %v1429_v8 = vpack.c.bf16 %v291_v52, %v284_v24  ;;  %v2291_v47 = vand.u32 4294901760, %v1937_v18  ;;  %v410_v9 = vand.u32 4294901760, %v409_v55 }
  0x2f   :  { %2339 = vst [vmem:[#allocation18_spill] sm:$0xff] %v1947_v19  ;;  %v417_v13 = vand.u32 4294901760, %v416_v3  ;;  %v2294_v35 = vand.u32 4294901760, %v1947_v19  ;;  %v297_v59 = vsub.f32 %v1880_v54, %v2288_v36  ;;  %v304_v6 = vsub.f32 %v1894_v53, %v2290_v10 }
  0x30   :  { %2340 = vst [vmem:[#allocation19_spill] sm:$0xff] %v1951_v2  ;;  %1430 = vmatpush3.bf16.msra.mxu1 %v1429_v8  ;;  %v151_v44 = vsub.f32 %v1937_v18, %v2291_v47  ;;  %v1441_v23 = vpack.c.bf16 %v1656_v21, %v1646_v15  ;;  %v2295_v55 = vand.u32 4294901760, %v1898_v37  ;;  %v2296_v24 = vand.u32 4294901760, %v1910_v34 }
  0x31   :  { %v1431_v52 = vpack.c.bf16 %v417_v13, %v410_v9  ;;  %v157_v3 = vsub.f32 %v1947_v19, %v2294_v35  ;;  %v298_v36 = vand.u32 4294901760, %v297_v59  ;;  %v305_v1 = vand.u32 4294901760, %v304_v6  ;;  %v15_v9 = vld [vmem:[%s2253_s1 + $0x18] sm:$0xff]  ;;  %v14_v19 = vld [vmem:[%s2253_s1 + $0x10] sm:$0xff] }
  0x32   :  { %v152_v10 = vand.u32 4294901760, %v151_v44  ;;  %v423_v8 = vsub.f32 %v1898_v37, %v2295_v55  ;;  %v430_v47 = vsub.f32 %v1910_v34, %v2296_v24  ;;  %v2300_v33 = vand.u32 4294901760, %v1919_v41 }
  0x33   :  { %1432 = vmatprep.subr.bf16.mxu1 %v1431_v52  ;;  %v158_v13 = vand.u32 4294901760, %v157_v3  ;;  %v1433_v35 = vpack.c.bf16 %v305_v1, %v298_v36  ;;  %v1443_v59 = vpack.c.bf16 %v1669_v26, %v1667_v25  ;;  %v2299_v6 = vand.u32 4294901760, %v1951_v2 }
  0x34   :  { %153 = vmatprep.mubr.f32.mxu0 %v152_v10  ;;  %v424_v44 = vand.u32 4294901760, %v423_v8  ;;  %v431_v55 = vand.u32 4294901760, %v430_v47  ;;  %v311_v24 = vsub.f32 %v1919_v41, %v2300_v33  ;;  %v1993_v36 = vand.u32 4294901760, %v15_v9  ;;  %v17_v47 = vld [vmem:[%s2253_s1 + $0x28] sm:$0xff]  ;;  %v16_v10 = vld [vmem:[%s2253_s1 + $0x20] sm:$0xff] }
  0x35   :  { %159 = vmatmul.mubr.f32.vlgmr.msra.gmra.mrb[0].mxu0 %v158_v13  ;;  %1434 = vmatpush3.bf16.msra.mxu1 %v1433_v35  ;;  %v318_v1 = vsub.f32 %v1951_v2, %v2299_v6  ;;  %v1445_v35 = vpack.c.bf16 %v1686_v38, %v1673_v28  ;;  %v1447_v13 = vpack.c.bf16 %v1696_v43, %v1690_v40  ;;  %v2008_v33 = vand.u32 4294901760, %v14_v19 }
  0x36   :  { %1442 = vmatpush3.bf16.msra.mxu0 %v1441_v23  ;;  %v1435_v52 = vpack.c.bf16 %v431_v55, %v424_v44  ;;  %v312_v3 = vand.u32 4294901760, %v311_v24  ;;  %v2006_v6 = vsub.f32 %v15_v9, %v1993_v36  ;;  %v2013_v23 = vand.u32 4294901760, %v17_v47  ;;  %v18_v24 = vld [vmem:[%s2253_s1 + $0x30] sm:$0xff]  ;;  %s1602_s1 = smov [#allocation2]  }
  0x37   :  { %1444 = vmatprep.subr.bf16.mxu0 %v1443_v59  ;;  %v319_v8 = vand.u32 4294901760, %v318_v1  ;;  %v2015_v55 = vand.u32 4294901760, %v16_v10  ;;  %v1449_v9 = vpack.c.bf16 %v1725_v58, %v1701_v46  ;;  %v2024_v1 = vsub.f32 %v14_v19, %v2008_v33  ;;  %s1100_s4 = sshll.u32 %s1602_s1, 4  ;;  %s1101_s4 = int_to_ptr.vmem [resolvable:$true] %s1100_s4 }
  0x38   :  { %2341 = vst [vmem:[#allocation20_spill] sm:$0xff] %v2006_v6  ;;  %1436 = vmatprep.subr.bf16.mxu1 %v1435_v52  ;;  %v2311_v44 = vand.u32 4294901760, %v2006_v6  ;;  %v1451_v52 = vpack.c.bf16 %v1750_v12, %v1729_v63  ;;  %v2029_v48 = vsub.f32 %v17_v47, %v2013_v23  ;;  %v2034_v2 = vand.u32 4294901760, %v19_v11  ;;  %s1578_s5 = scalar_lea.vmem %s1101_s4, 512  ;;  %p1583_p1 = scmp.lt.s32.totalorder %s1101_s4, %s1101_s4 }
  0x39   :  { %v1437_v59 = vpack.c.bf16 %v319_v8, %v312_v3  ;;  %v2032_v4 = vsub.f32 %v16_v10, %v2015_v55  ;;  %v1453_v3 = vpack.c.bf16 %v1768_v42, %v1754_v17  ;;  %v2042_v8 = vand.u32 4294901760, %v18_v24  ;;  %p1579_p0 = scmp.ne.s32.totalorder %s1101_s4, %s1578_s5  ;;  %p1584_p2 = scmp.lt.s32.totalorder %s1578_s5, %s1578_s5 }
  0x3a   :  { %1446 = vmatpush3.bf16.msra.mxu0 %v1445_v35  ;;  %v166_v19 = vsub.f32 %v2006_v6, %v2311_v44  ;;  %v2319_v35 = vand.u32 4294901760, %v2024_v1  ;;  %v1455_v47 = vpack.c.bf16 %v1787_v60, %v1772_v50  ;;  %v2320_v10 = vand.u32 4294901760, %v2029_v48 }
  0x3b   :  { %2342 = vst [vmem:[#allocation21_spill] sm:$0xff] %v2032_v4  ;;  %1438 = vmatpush3.bf16.msra.mxu1 %v1437_v59  ;;  %1448 = vmatprep.subr.bf16.mxu0 %v1447_v13  ;;  %v2323_v13 = vand.u32 4294901760, %v2032_v4  ;;  %v2050_v59 = vsub.f32 %v19_v11, %v2034_v2  ;;  %v2056_v6 = vsub.f32 %v18_v24, %v2042_v8  ;;  %v2344_v49 = vand.u32 4294901760, %v1678_v32  ;;  %p1585_p3 = por %p1584_p2, %p1583_p1 }
  0x3c   :  { %1472 = vmatprep.subr.bf16.mxu1 %v1644_v14  ;;  %v167_v41 = vand.u32 4294901760, %v166_v19  ;;  %v172_v44 = vsub.f32 %v2024_v1, %v2319_v35  ;;  %v2343_v14 = vand.u32 4294901760, %v1676_v31  ;;  %v181_v11 = vsub.f32 %v2029_v48, %v2320_v10 }
  0x3d   :  { %v187_v19 = vsub.f32 %v2032_v4, %v2323_v13  ;;  %v2345_v35 = vand.u32 4294901760, %v1646_v15  ;;  %v2346_v31 = vand.u32 4294901760, %v1656_v21  ;;  %v2348_v10 = vand.u32 4294901760, %v1669_v26  ;;  %p1586_p4 = pnand %p1585_p3, %p1579_p0 }
  0x3e   :  { %v2062_v34 = vpack.c.bf16 %v2344_v49, %v2343_v14  ;;  %436 = vmatmul.mubr.f32.vlgmr.msra.gmra.mrb[0].mxu1 %v1934_v57  ;;  %1450 = vmatpush3.bf16.msra.mxu0 %v1449_v9  ;;  %v173_v14 = vand.u32 4294901760, %v172_v44  ;;  %v201_v49 = vand.u32 4294901760, %v2056_v6  ;;  %v2347_v9 = vand.u32 4294901760, %v1667_v25 }
  0x3f   :  { %v1505_v32 = vpack.c.bf16 %v2346_v31, %v2345_v35  ;;  %1474 = vmatpush3.bf16.msra.mxu1 %v1654_v20  ;;  %1452 = vmatprep.subr.bf16.mxu0 %v1451_v52  ;;  %v2349_v13 = vand.u32 4294901760, %v1673_v28  ;;  %v2350_v24 = vand.u32 4294901760, %v1686_v38  ;;  %v1457_v15 = vpack.c.bf16 %v1810_v30, %v1796_v5 }
  0x40   :  { %v1507_v57 = vpack.c.bf16 %v2348_v10, %v2347_v9  ;;  %1476 = vmatprep.subr.bf16.mxu1 %v1658_v22  ;;  %168 = vmatprep.mubr.f32.mxu0 %v167_v41  ;;  %v182_v21 = vand.u32 4294901760, %v181_v11  ;;  %v2351_v44 = vand.u32 4294901760, %v2050_v59  ;;  %v2352_v25 = vand.u32 4294901760, %v1690_v40 }
  0x41   :  { %v1509_v4 = vpack.c.bf16 %v2350_v24, %v2349_v13  ;;  %v2353_v26 = vand.u32 4294901760, %v1696_v43  ;;  %174 = vmatmul.mubr.f32.gmra.mrb[2].mxu0 %v173_v14  ;;  %v188_v28 = vand.u32 4294901760, %v187_v19  ;;  %441 = vmatprep.mubr.f32.mxu1 %v1993_v36  ;;  %v202_v38 = vsub.f32 %v2056_v6, %v201_v49 }
  0x42   :  { %v196_v52 = vsub.f32 %v2050_v59, %v2351_v44  ;;  %v2354_v41 = vand.u32 4294901760, %v1701_v46  ;;  %v2355_v10 = vand.u32 4294901760, %v1725_v58  ;;  %v2356_v11 = vand.u32 4294901760, %v1729_v63  ;;  %1454 = vmatpush3.bf16.msra.mxu0 %v1453_v3  ;;  %183 = vmatprep.mubr.f32.mxu0 %v182_v21 }
  0x43   :  { %v1511_v35 = vpack.c.bf16 %v2353_v26, %v2352_v25  ;;  %v2357_v40 = vand.u32 4294901760, %v1750_v12  ;;  %v2358_v19 = vand.u32 4294901760, %v1754_v17  ;;  %v2359_v31 = vand.u32 4294901760, %v1768_v42  ;;  %1478 = vmatpush3.bf16.msra.mxu1 %v1671_v27  ;;  %1456 = vmatprep.subr.bf16.mxu0 %v1455_v47  ;;  %v2370_v25 = vld [vmem:[#allocation19_spill] sm:$0xff] }
  0x44   :  { %v1513_v13 = vpack.c.bf16 %v2355_v10, %v2354_v41  ;;  %v197_v43 = vand.u32 4294901760, %v196_v52  ;;  %v2360_v9 = vand.u32 4294901760, %v1772_v50  ;;  %v2361_v46 = vand.u32 4294901760, %v1787_v60  ;;  %1480 = vmatprep.subr.bf16.mxu1 %v1688_v39  ;;  %443 = vmatmul.mubr.f32.gmra.mrb[2].mxu1 %v2008_v33  ;;  %v2369_v52 = vld [vmem:[#allocation15_spill] sm:$0xff]  ;;  %v2373_v41 = vld [vmem:[#allocation9_spill] sm:$0xff]  ;;  %v2374_v10 = vld [vmem:[#allocation10_spill] sm:$0xff] }
  0x45   :  { %v1515_v24 = vpack.c.bf16 %v2357_v40, %v2356_v11  ;;  %v1517_v14 = vpack.c.bf16 %v2359_v31, %v2358_v19  ;;  %v2362_v58 = vand.u32 4294901760, %v1796_v5  ;;  %v2363_v63 = vand.u32 4294901760, %v1810_v30  ;;  %189 = vmatmul.mubr.f32.gmra.mrb[4].mxu0 %v188_v28  ;;  %448 = vmatprep.mubr.f32.mxu1 %v2013_v23  ;;  %v2371_v28 = vld [vmem:[#allocation7_spill] sm:$0xff]  ;;  %v2375_v11 = vld [vmem:[#allocation18_spill] sm:$0xff]  ;;  %v2381_v31 = vld [vmem:[#allocation21_spill] sm:$0xff] }
  0x46   :  { %v2116_v44 = vpack.c.bf16 %v2361_v46, %v2360_v9  ;;  %v1459_v17 = vpack.c.bf16 %v1829_v56, %v1814_v51  ;;  %v2364_v42 = vand.u32 4294901760, %v1814_v51  ;;  %v2365_v50 = vand.u32 4294901760, %v1829_v56  ;;  %1458 = vmatpush3.bf16.msra.mxu0 %v1457_v15  ;;  %198 = vmatprep.mubr.f32.mxu0 %v197_v43  ;;  %v2366_v56 = vld [vmem:[#allocation13_spill] sm:$0xff]  ;;  %v2367_v15 = vld [vmem:[#allocation6_spill] sm:$0xff]  ;;  %v2377_v40 = vld [vmem:[#allocation11_spill] sm:$0xff] }
  0x47   :  { %v2122_v12 = vpack.c.bf16 %v2363_v63, %v2362_v58  ;;  %v203_v60 = vand.u32 4294901760, %v202_v38  ;;  %v1461_v5 = vpack.c.bf16 %v1852_v61, %v1838_v0  ;;  %1482 = vmatpush3.bf16.msra.mxu1 %v1699_v45  ;;  %v1463_v30 = vpack.c.bf16 %v1871_v29, %v1856_v7  ;;  %v2372_v38 = vld [vmem:[#allocation8_spill] sm:$0xff]  ;;  %v2379_v19 = vld [vmem:[#allocation14_spill] sm:$0xff] }
  0x48   :  { %v2131_v3 = vpack.c.bf16 %v2365_v50, %v2364_v42  ;;  %1460 = vmatprep.subr.bf16.mxu0 %v1459_v17  ;;  %1484 = vmatprep.subr.bf16.mxu1 %v1727_v62  ;;  %v1465_v51 = vpack.c.bf16 %v1894_v53, %v1880_v54  ;;  %v1467_v47 = vpack.c.bf16 %v2366_v56, %v1898_v37  ;;  %v2368_v21 = vand.u32 4294901760, %v1937_v18  ;;  %v2378_v43 = vld [vmem:[#allocation12_spill] sm:$0xff] }
  0x49   :  { %450 = vmatmul.mubr.f32.gmra.mrb[4].mxu1 %v2015_v55  ;;  %204 = vmatmul.mubr.f32.gmra.mrb[6].mxu0 %v203_v60  ;;  %v1469_v26 = vpack.c.bf16 %v2370_v25, %v2369_v52  ;;  %vm1090_vm0 = vcmask 261120  }
  0x4a   :  { %455 = vmatprep.mubr.f32.mxu1 %v2034_v2  ;;  %1462 = vmatpush3.bf16.msra.mxu0 %v1461_v5 }
  0x4b   :  { %592 = vmatprep.mubr.f32.mxu0 %v1937_v18  ;;  %1486 = vmatpush3.bf16.msra.mxu1 %v1752_v16  ;;  %v2376_v18 = vld [vmem:[#allocation20_spill] sm:$0xff] }
  0x4c   :  { %1464 = vmatprep.subr.bf16.mxu0 %v1463_v30  ;;  %1488 = vmatprep.subr.bf16.mxu1 %v2367_v15 }
  0x4d   :  { %457 = vmatmul.mubr.f32.gmra.mrb[6].mxu1 %v2042_v8 }
  0x4e   :  { %726 = vmatprep.mubr.f32.mxu1 %v2368_v21  ;;  %1466 = vmatpush3.bf16.msra.mxu0 %v1465_v51 }
  0x4f   :  { %1490 = vmatpush3.bf16.msra.mxu1 %v2371_v28  ;;  %1468 = vmatprep.subr.bf16.mxu0 %v1467_v47 }
  0x50   :  { %1492 = vmatprep.subr.bf16.mxu1 %v2372_v38 }
  0x52   :  { %1470 = vmatpush3.bf16.msra.mxu0 %v1469_v26 }
  0x53   :  { %1494 = vmatpush3.bf16.msra.mxu1 %v2373_v41  ;;  %1504 = vmatprep.subr.bf16.mxu0 %v2062_v34  ;;  %v2380_v34 = vld [vmem:[#allocation5_spill] sm:$0xff] }
  0x54   :  { %1496 = vmatprep.subr.bf16.mxu1 %v2374_v10 }
  0x55   :  { %595 = vmatmul.mubr.f32.vlgmr.msra.gmra.mrb[8].mxu0 %v2375_v11 }
  0x56   :  { %1506 = vmatpush3.bf16.msra.mxu0 %v1505_v32  ;;  %601 = vmatprep.mubr.f32.mxu0 %v2376_v18  ;;  %v2382_v32 = vand.u32 4294901760, %v2375_v11 }
  0x57   :  { %1498 = vmatpush3.bf16.msra.mxu1 %v2377_v40  ;;  %1508 = vmatprep.subr.bf16.mxu0 %v1507_v57  ;;  %v2383_v57 = vand.u32 4294901760, %v2376_v18 }
  0x58   :  { %1500 = vmatprep.subr.bf16.mxu1 %v2378_v43 }
  0x59   :  { %604 = vmatmul.mubr.f32.gmra.mrb[10].mxu0 %v2024_v1 }
  0x5a   :  { %1510 = vmatpush3.bf16.msra.mxu0 %v1509_v4  ;;  %610 = vmatprep.mubr.f32.mxu0 %v2029_v48  ;;  %v2384_v4 = vand.u32 4294901760, %v2024_v1  ;;  %v2389_v1 = vand.u32 4294901760, %v1852_v61  ;;  %v2393_v61 = vand.u32 4294901760, %v1880_v54  ;;  %v2398_v54 = vand.u32 4294901760, %v2370_v25 }
  0x5b   :  { %1502 = vmatpush3.bf16.msra.mxu1 %v2379_v19  ;;  %1512 = vmatprep.subr.bf16.mxu0 %v1511_v35  ;;  %v2385_v35 = vand.u32 4294901760, %v2029_v48  ;;  %v2391_v48 = vand.u32 4294901760, %v1856_v7  ;;  %v2395_v7 = vand.u32 4294901760, %v1898_v37 }
  0x5c   :  { %1536 = vmatprep.subr.bf16.mxu1 %v2380_v34 }
  0x5d   :  { %613 = vmatmul.mubr.f32.gmra.mrb[12].mxu0 %v2381_v31 }
  0x5e   :  { %730 = vmatmul.mubr.f32.vlgmr.msra.gmra.mrb[8].mxu1 %v2382_v32  ;;  %1514 = vmatpush3.bf16.msra.mxu0 %v1513_v13  ;;  %v2387_v13 = vand.u32 4294901760, %v2381_v31 }
  0x5f   :  { %1538 = vmatpush3.bf16.msra.mxu1 %v1654_v20  ;;  %619 = vmatprep.mubr.f32.mxu0 %v2050_v59  ;;  %v2386_v20 = vld [vmem:[#allocation16_spill] sm:$0xff] }
  0x60   :  { %737 = vmatprep.mubr.f32.mxu1 %v2383_v57  ;;  %1516 = vmatprep.subr.bf16.mxu0 %v1515_v24 }
  0x61   :  { %622 = vmatmul.mubr.f32.gmra.mrb[14].mxu0 %v2056_v6  ;;  %1540 = vmatprep.subr.bf16.mxu1 %v1658_v22  ;;  %v2388_v22 = vand.u32 4294901760, %v1838_v0 }
  0x62   :  { %741 = vmatmul.mubr.f32.gmra.mrb[10].mxu1 %v2384_v4  ;;  %1518 = vmatpush3.bf16.msra.mxu0 %v1517_v14 }
  0x63   :  { %1542 = vmatpush3.bf16.msra.mxu1 %v1671_v27  ;;  %748 = vmatprep.mubr.f32.mxu1 %v2385_v35  ;;  %v1525_v24 = vpack.c.bf16 %v2389_v1, %v2388_v22  ;;  %v2390_v27 = vand.u32 4294901760, %v2050_v59 }
  0x64   :  { %1520 = vmatprep.subr.bf16.mxu0 %v2116_v44  ;;  %1544 = vmatprep.subr.bf16.mxu1 %v1688_v39  ;;  %v2392_v39 = vand.u32 4294901760, %v1871_v29  ;;  %v2396_v29 = vand.u32 4294901760, %v2366_v56 }
  0x65   :  { %929 = vmatprep.mubr.f32.mxu0 %v2386_v20 }
  0x66   :  { %752 = vmatmul.mubr.f32.gmra.mrb[12].mxu1 %v2387_v13  ;;  %1522 = vmatpush3.bf16.msra.mxu0 %v2122_v12  ;;  %v1527_v14 = vpack.c.bf16 %v2392_v39, %v2391_v48  ;;  %v1531_v59 = vpack.c.bf16 %v2396_v29, %v2395_v7 }
  0x67   :  { %1546 = vmatpush3.bf16.msra.mxu1 %v1699_v45  ;;  %759 = vmatprep.mubr.f32.mxu1 %v2390_v27  ;;  %v2394_v45 = vand.u32 4294901760, %v1894_v53  ;;  %v2399_v53 = vld [vmem:[#allocation17_spill] sm:$0xff] }
  0x68   :  { %1524 = vmatprep.subr.bf16.mxu0 %v2131_v3  ;;  %1548 = vmatprep.subr.bf16.mxu1 %v1727_v62  ;;  %v2397_v62 = vand.u32 4294901760, %v2369_v52 }
  0x69   :  { %v1529_v0 = vpack.c.bf16 %v2394_v45, %v2393_v61 }
  0x6a   :  { %763 = vmatmul.mubr.f32.gmra.mrb[14].mxu1 %v201_v49  ;;  %1526 = vmatpush3.bf16.msra.mxu0 %v1525_v24  ;;  %v1533_v6 = vpack.c.bf16 %v2398_v54, %v2397_v62 }
  0x6b   :  { %1550 = vmatpush3.bf16.msra.mxu1 %v1752_v16  ;;  %1528 = vmatprep.subr.bf16.mxu0 %v1527_v14 }
  0x6c   :  { %1552 = vmatprep.subr.bf16.mxu1 %v2367_v15  ;;  %1054 = vmatprep.mubr.f32.mxu1 %v2386_v20 }
  0x6e   :  { %1530 = vmatpush3.bf16.msra.mxu0 %v1529_v0 }
  0x6f   :  { %1554 = vmatpush3.bf16.msra.mxu1 %v2371_v28  ;;  %1532 = vmatprep.subr.bf16.mxu0 %v1531_v59 }
  0x70   :  { %1556 = vmatprep.subr.bf16.mxu1 %v2372_v38 }
  0x72   :  { %1534 = vmatpush3.bf16.msra.mxu0 %v1533_v6 }
  0x73   :  { %1558 = vmatpush3.bf16.msra.mxu1 %v2373_v41 }
  0x74   :  { %1560 = vmatprep.subr.bf16.mxu1 %v2374_v10 }
  0x75   :  { %931 = vmatmul.mubr.f32.vlgmr.msra.gmra.mrb[16].mxu0 %v2399_v53 }
  0x76   :  { %936 = vmatprep.mubr.f32.mxu0 %v1993_v36 }
  0x77   :  { %1562 = vmatpush3.bf16.msra.mxu1 %v2377_v40 }
  0x78   :  { %1564 = vmatprep.subr.bf16.mxu1 %v2378_v43 }
  0x79   :  { %938 = vmatmul.mubr.f32.gmra.mrb[18].mxu0 %v2008_v33 }
  0x7a   :  { %943 = vmatprep.mubr.f32.mxu0 %v2013_v23 }
  0x7b   :  { %1566 = vmatpush3.bf16.msra.mxu1 %v2379_v19 }
  0x7d   :  { %945 = vmatmul.mubr.f32.gmra.mrb[20].mxu0 %v2015_v55 }
  0x7e   :  { %1056 = vmatmul.mubr.f32.vlgmr.msra.gmra.mrb[16].mxu1 %v2399_v53  ;;  %950 = vmatprep.mubr.f32.mxu0 %v2034_v2 }
  0x7f   :  { %1061 = vmatprep.mubr.f32.mxu1 %v1993_v36 }
  0x81   :  { %952 = vmatmul.mubr.f32.gmra.mrb[22].mxu0 %v2042_v8 }
  0x82   :  { %1063 = vmatmul.mubr.f32.gmra.mrb[18].mxu1 %v2008_v33 }
  0x83   :  { %1068 = vmatprep.mubr.f32.mxu1 %v2013_v23 }
  0x86   :  { %1070 = vmatmul.mubr.f32.gmra.mrb[20].mxu1 %v2015_v55 }
  0x87   :  { %1075 = vmatprep.mubr.f32.mxu1 %v2034_v2 }
  0x8a   :  { %1077 = vmatmul.mubr.f32.gmra.mrb[22].mxu1 %v2042_v8 }
 0x108   :  { %v1143_v16 = vpop.f32.mrb[0].mxu0 }
 0x109   :  { %v1144_v37 = vpop.f32.mrb[1].mxu0 }
 0x10a   :  { %v1145_v49 = vadd.f32 %v1144_v37, %v1143_v16 }
 0x111   :  { %v1187_v9 = vpop.f32.mrb[0].mxu1 }
 0x112   :  { %v1188_v46 = vpop.f32.mrb[1].mxu1 }
 0x113   :  { %v1189_v44 = vadd.f32 %v1188_v46, %v1187_v9 }
 0x114   :  { %v1146_v58 = vpop.f32.mrb[2].mxu0 }
 0x115   :  { %v438_v36 = vadd.f32 %v1189_v44, %v1145_v49  ;;  %v1147_v63 = vpop.f32.mrb[3].mxu0 }
 0x116   :  { %v1148_v12 = vadd.f32 %v1147_v63, %v1146_v58 }
 0x117   :  { %v1190_v17 = vpop.f32.mrb[2].mxu1 }
 0x118   :  { %v1191_v33 = vpop.f32.mrb[3].mxu1  ;;  %v1149_v42 = vpop.f32.mrb[4].mxu0 }
 0x119   :  { %v1192_v23 = vadd.f32 %v1191_v33, %v1190_v17  ;;  %v1150_v50 = vpop.f32.mrb[5].mxu0 }
 0x11a   :  { %v1151_v55 = vadd.f32 %v1150_v50, %v1149_v42 }
 0x11b   :  { %v445_v3 = vadd.f32 %v1192_v23, %v1148_v12 }
 0x11c   :  { %v1193_v2 = vpop.f32.mrb[4].mxu1  ;;  %v1152_v60 = vpop.f32.mrb[6].mxu0 }
 0x11d   :  { %v1194_v8 = vpop.f32.mrb[5].mxu1  ;;  %v1153_v5 = vpop.f32.mrb[7].mxu0 }
 0x11e   :  { %v1195_v30 = vadd.f32 %v1194_v8, %v1193_v2  ;;  %v1154_v51 = vadd.f32 %v1153_v5, %v1152_v60 }
 0x120   :  { %v452_v56 = vadd.f32 %v1195_v30, %v1151_v55  ;;  %v1196_v47 = vpop.f32.mrb[6].mxu1 }
 0x121   :  { %v1197_v15 = vpop.f32.mrb[7].mxu1 }
 0x122   :  { %v1198_v21 = vadd.f32 %v1197_v15, %v1196_v47 }
 0x124   :  { %v459_v52 = vadd.f32 %v1198_v21, %v1154_v51 }
 0x128   :  { %v1231_v25 = vpop.f32.mrb[8].mxu0 }
 0x129   :  { %v1232_v26 = vpop.f32.mrb[9].mxu0 }
 0x12a   :  { %v1233_v28 = vadd.f32 %v1232_v26, %v1231_v25 }
 0x12c   :  { %v597_v38 = vadd.f32 %v1233_v28, %v438_v36  ;;  %v1234_v41 = vpop.f32.mrb[10].mxu0 }
 0x12d   :  { %v1235_v10 = vpop.f32.mrb[11].mxu0 }
 0x12e   :  { %v1236_v11 = vadd.f32 %v1235_v10, %v1234_v41 }
 0x130   :  { %v606_v18 = vadd.f32 %v1236_v11, %v445_v3  ;;  %v1237_v40 = vpop.f32.mrb[12].mxu0 }
 0x131   :  { %v1275_v43 = vpop.f32.mrb[8].mxu1  ;;  %v1238_v19 = vpop.f32.mrb[13].mxu0 }
 0x132   :  { %v1239_v34 = vadd.f32 %v1238_v19, %v1237_v40  ;;  %v1276_v31 = vpop.f32.mrb[9].mxu1 }
 0x133   :  { %v1277_v32 = vadd.f32 %v1276_v31, %v1275_v43 }
 0x134   :  { %v615_v57 = vadd.f32 %v1239_v34, %v452_v56  ;;  %v1240_v4 = vpop.f32.mrb[14].mxu0 }
 0x135   :  { %v732_v35 = vadd.f32 %v1277_v32, %v597_v38  ;;  %v1278_v20 = vpop.f32.mrb[10].mxu1  ;;  %v1241_v13 = vpop.f32.mrb[15].mxu0 }
 0x136   :  { %v1242_v22 = vadd.f32 %v1241_v13, %v1240_v4  ;;  %v1279_v1 = vpop.f32.mrb[11].mxu1 }
 0x137   :  { %v1280_v24 = vadd.f32 %v1279_v1, %v1278_v20 }
 0x138   :  { %v624_v27 = vadd.f32 %v1242_v22, %v459_v52 }
 0x139   :  { %v743_v48 = vadd.f32 %v1280_v24, %v606_v18  ;;  %v1281_v39 = vpop.f32.mrb[12].mxu1 }
 0x13a   :  { %v1282_v14 = vpop.f32.mrb[13].mxu1 }
 0x13b   :  { %v1283_v61 = vadd.f32 %v1282_v14, %v1281_v39 }
 0x13d   :  { %v754_v45 = vadd.f32 %v1283_v61, %v615_v57  ;;  %v1284_v0 = vpop.f32.mrb[14].mxu1 }
 0x13e   :  { %v1285_v7 = vpop.f32.mrb[15].mxu1 }
 0x13f   :  { %v1286_v29 = vadd.f32 %v1285_v7, %v1284_v0 }
 0x141   :  { %v765_v59 = vadd.f32 %v1286_v29, %v624_v27 }
 0x148   :  { %v1319_v62 = vpop.f32.mrb[16].mxu0 }
 0x149   :  { %v1320_v54 = vpop.f32.mrb[17].mxu0 }
 0x14a   :  { %v1321_v6 = vadd.f32 %v1320_v54, %v1319_v62 }
 0x14c   :  { %v933_v53 = vadd.f32 %v1321_v6, %v732_v35  ;;  %v1322_v16 = vpop.f32.mrb[18].mxu0 }
 0x14d   :  { %v1323_v37 = vpop.f32.mrb[19].mxu0 }
 0x14e   :  { %v1324_v49 = vadd.f32 %v1323_v37, %v1322_v16 }
 0x150   :  { %v940_v9 = vadd.f32 %v1324_v49, %v743_v48  ;;  %v1325_v46 = vpop.f32.mrb[20].mxu0 }
 0x151   :  { %v1363_v44 = vpop.f32.mrb[16].mxu1  ;;  %v1326_v58 = vpop.f32.mrb[21].mxu0 }
 0x152   :  { %v1327_v36 = vadd.f32 %v1326_v58, %v1325_v46  ;;  %v1364_v63 = vpop.f32.mrb[17].mxu1 }
 0x153   :  { %v1365_v12 = vadd.f32 %v1364_v63, %v1363_v44 }
 0x154   :  { %v947_v17 = vadd.f32 %v1327_v36, %v754_v45  ;;  %v1328_v33 = vpop.f32.mrb[22].mxu0 }
 0x155   :  { %v1058_v42 = vadd.f32 %v1365_v12, %v933_v53  ;;  %v1366_v23 = vpop.f32.mrb[18].mxu1  ;;  %v1329_v50 = vpop.f32.mrb[23].mxu0 }
 0x156   :  { %v1330_v55 = vadd.f32 %v1329_v50, %v1328_v33  ;;  %v1367_v3 = vpop.f32.mrb[19].mxu1 }
 0x157   :  { %v1082_v2 = vmul.f32 1.442695, %v1058_v42  ;;  %v1368_v60 = vadd.f32 %v1367_v3, %v1366_v23 }
 0x158   :  { %v954_v8 = vadd.f32 %v1330_v55, %v765_v59 }
 0x159   :  { %1570 = vpow2.f32 %v1082_v2  ;;  %v1065_v5 = vadd.f32 %v1368_v60, %v940_v9  ;;  %v1369_v30 = vpop.f32.mrb[20].mxu1 }
 0x15a   :  { %v1370_v51 = vpop.f32.mrb[21].mxu1 }
 0x15b   :  { %v1084_v56 = vmul.f32 1.442695, %v1065_v5  ;;  %v1371_v47 = vadd.f32 %v1370_v51, %v1369_v30 }
 0x15d   :  { %1572 = vpow2.f32 %v1084_v56  ;;  %v1072_v15 = vadd.f32 %v1371_v47, %v947_v17  ;;  %v1372_v21 = vpop.f32.mrb[22].mxu1 }
 0x15e   :  { %v1373_v52 = vpop.f32.mrb[23].mxu1 }
 0x15f   :  { %v1086_v25 = vmul.f32 1.442695, %v1072_v15  ;;  %v1374_v26 = vadd.f32 %v1373_v52, %v1372_v21 }
 0x161   :  { %1574 = vpow2.f32 %v1086_v25  ;;  %v1079_v28 = vadd.f32 %v1374_v26, %v954_v8 }
 0x163   :  { %v1571_v38 = vpop.eup %1570  ;;  %v1088_v41 = vmul.f32 1.442695, %v1079_v28 }
 0x164   :  { %1091 = vst.msk [vmem:[#allocation2] sm:$0xff] %vm1090_vm0, %v1571_v38 }
 0x165   :  { %1576 = vpow2.f32 %v1088_v41 }
 0x167   :  { %v1573_v10 = vpop.eup %1572 }
 0x168   :  { %1092 = vst.msk [vmem:[#allocation2 + $0x8] sm:$0xff] %vm1090_vm0, %v1573_v10 }
 0x16b   :  { %v1575_v11 = vpop.eup %1574 }
 0x16c   :  { %1093 = vst.msk [vmem:[#allocation2 + $0x10] sm:$0xff] %vm1090_vm0, %v1575_v11 }
 0x16f   :  { %v1577_v18 = vpop.eup %1576 }
 0x170   :  { %1094 = vst.msk [vmem:[#allocation2 + $0x18] sm:$0xff] %vm1090_vm0, %v1577_v18 }
 0x171   :  { %1589 = shalt.err (!%p1586_p4)
}
 0x172   :  { %s1590_s8 = scalar_lea.hbm %s2254_s2, 512 }
 0x173   :  { %p1591_p5 = scmp.ne.s32.totalorder %s2254_s2, %s1590_s8  ;;  %p1594_p6 = scmp.lt.u32.totalorder %s1590_s8, %s2254_s2 }
 0x175   :  { %p1596_p7 = pnand %p1594_p6, %p1591_p5 }
 0x177   :  { %1599 = shalt.err (!%p1596_p7)
}
 0x178   :  { %s1603_s13 = smov 128   ;;  %s1604_s14 = smov 8  }
 0x179   :  { %1106 = dma.vmem_to_hbm [thread:$0]  %s1101_s4, 512, %s2254_s2, [#allocation3], %s1603_s13, %s1603_s13, %s1604_s14  }
 0x17a   :  { %1600 = dma.done.wait [#allocation3], 512  }
 0x17b   :  { %1601 = vsyncadd [#allocation3], 4294966784 }
 0x17c   :  { %1110 = vsyncpa [#allocation3], 1 }

</bundles_post_ra>
